<compile_context>
chip_gen: v7x
topology: tpu7x:2x2x1
jax: 0.10.0
libtpu: 0.0.40
codegen_flags: <defaults>
</compile_context>

<pallas_src>
import jax
import jax.numpy as jnp
from jax.experimental import pallas as pl
from jax.experimental.pallas import tpu as pltpu


def linear_kernel(x_ref, w_ref, b_ref, o_ref):
    # x_ref: (TB, K), w_ref: (K, N) already K-major (transpose / block-diag
    # construction done once in the wrapper), b_ref: (1, N), o_ref: (TB, N).
    acc = jnp.dot(x_ref[...], w_ref[...], preferred_element_type=jnp.float32)
    o_ref[...] = (acc + b_ref[...]).astype(o_ref.dtype)


# Batch-fold factor: 8 samples per folded row -> 320 input lanes / 160 output
# lanes.  Keeps the block-diagonal MXU overhead (8x the useful FLOPs) safely
# under the HBM roofline even on v5e's 197 TF/s MXU.
_FOLD = 8
# Max folded rows per grid step (= 16384 original rows = ~2.6 MB x-tile).
_MAX_TILE_ROWS_F = 2048
# Below this batch size the whole problem is a few hundred KB at most: use a
# single gridless VMEM call (no pipeline scaffolding, no grid overhead).
_SMALL_B_MAX = 1024


def _round_up(n, m):
    return ((n + m - 1) // m) * m


@jax.jit
def mynet_forward(x, weight, bias):
    """Equivalent of MyNet.forward: x @ weight.T + bias.

    Args:
      x:      (B, F_in)     float32
      weight: (F_out, F_in) float32  (PyTorch nn.Linear layout)
      bias:   (F_out,)      float32
    Returns:
      (B, F_out) float32
    """
    B, F_in = x.shape
    F_out = weight.shape[0]
    w_t = weight.T                      # (F_in, F_out), K-major; fused under jit
    b2d = bias.reshape(1, F_out)

    if B <= _SMALL_B_MAX:
        # Gridless path: whole problem resident in VMEM, one kernel body.
        return pl.pallas_call(
            linear_kernel,
            out_shape=jax.ShapeDtypeStruct((B, F_out), x.dtype),
            in_specs=[
                pl.BlockSpec(memory_space=pltpu.MemorySpace.VMEM),
                pl.BlockSpec(memory_space=pltpu.MemorySpace.VMEM),
                pl.BlockSpec(memory_space=pltpu.MemorySpace.VMEM),
            ],
            out_specs=pl.BlockSpec(memory_space=pltpu.MemorySpace.VMEM),
            cost_estimate=pl.CostEstimate(
                flops=2 * B * F_in * F_out,
                transcendentals=0,
                bytes_accessed=4 * (B * F_in + F_in * F_out + F_out + B * F_out),
            ),
        )(x, w_t, b2d)

    # ---- Large-batch path: lane-dense batch folding + batch-tiled grid ----
    # Pad B to a multiple of _FOLD (zero rows; sliced off at the end).
    pad = (-B) % _FOLD
    if pad:
        x = jnp.concatenate([x, jnp.zeros((pad, F_in), x.dtype)], axis=0)
    rows_f = (B + pad) // _FOLD
    k_f = _FOLD * F_in                  # 320 folded input lanes
    n_f = _FOLD * F_out                 # 160 folded output lanes

    # Fold 8 consecutive samples into one lane-dense row (contiguous reshape).
    x_f = x.reshape(rows_f, k_f)
    # Block-diagonal weight with W^T on the diagonal; built once, resident
    # across the whole grid (constant index_map).
    eye = jnp.eye(_FOLD, dtype=w_t.dtype)
    w_bd = (eye[:, None, :, None] * w_t[None, :, None, :]).reshape(k_f, n_f)
    b_f = jnp.tile(bias, _FOLD).reshape(1, n_f)

    # Big tiles so DMA time dominates per-step overhead, but always >= 2 grid
    # steps so v7x's two TensorCores split the batch under "parallel".
    tile = min(_MAX_TILE_ROWS_F, _round_up(pl.cdiv(rows_f, 2), 8))
    grid = (pl.cdiv(rows_f, tile),)

    out_f = pl.pallas_call(
        linear_kernel,
        out_shape=jax.ShapeDtypeStruct((rows_f, n_f), x.dtype),
        grid=grid,
        in_specs=[
            pl.BlockSpec((tile, k_f), lambda i: (i, 0)),
            pl.BlockSpec((k_f, n_f), lambda i: (0, 0)),   # resident weight
            pl.BlockSpec((1, n_f), lambda i: (0, 0)),     # resident bias
        ],
        out_specs=pl.BlockSpec((tile, n_f), lambda i: (i, 0)),
        compiler_params=pltpu.CompilerParams(
            dimension_semantics=("parallel",)
        ),
    )(x_f, w_bd, b_f)

    # Unfold lanes back to (B, F_out); slice off the padded rows (fused).
    return out_f.reshape(rows_f * _FOLD, F_out)[:B]


if __name__ == "__main__":
    num_input = 40
    num_output = 20

    key = jax.random.PRNGKey(0)
    kx, kw, kb, kx2 = jax.random.split(key, 4)

    # nn.Linear default init: U(-1/sqrt(fan_in), 1/sqrt(fan_in))
    bound = 1.0 / jnp.sqrt(jnp.float32(num_input))
    weight = jax.random.uniform(
        kw, (num_output, num_input), jnp.float32, minval=-bound, maxval=bound
    )
    bias = jax.random.uniform(
        kb, (num_output,), jnp.float32, minval=-bound, maxval=bound
    )

    # Small batch: exercises the gridless whole-problem-in-VMEM path.
    batch = 8
    x = jax.random.normal(kx, (batch, num_input), jnp.float32)
    out = jax.block_until_ready(mynet_forward(x, weight, bias))
    ref = x @ weight.T + bias
    assert out.shape == (batch, num_output)
    assert jnp.allclose(out, ref, atol=1e-5, rtol=1e-5)

    # Larger batch (not a multiple of the fold): exercises the lane-dense
    # folded, batch-tiled 'parallel' grid path incl. padding + ragged block.
    big_batch = 4100
    x_big = jax.random.normal(kx2, (big_batch, num_input), jnp.float32)
    out_big = jax.block_until_ready(mynet_forward(x_big, weight, bias))
    ref_big = x_big @ weight.T + bias
    assert out_big.shape == (big_batch, num_output)
    assert jnp.allclose(out_big, ref_big, atol=1e-5, rtol=1e-5)

    print("KERNEL_OK")
</pallas_src>

<mosaic_0001>
module attributes {stable_mosaic.version = 11 : i64} {
  func.func @linear_kernel(%arg0: memref<8x40xf32, #tpu.memory_space<vmem>>, %arg1: memref<40x20xf32, #tpu.memory_space<vmem>>, %arg2: memref<1x20xf32, #tpu.memory_space<vmem>>, %arg3: memref<8x20xf32, #tpu.memory_space<vmem>>) attributes {dimension_semantics = [], scalar_prefetch = 0 : i64, scratch_operands = 0 : i64, tpu.core_type = #tpu.core_type<tc>} {
    %c0 = arith.constant 0 : index
    %c0_0 = arith.constant 0 : index
    %0 = vector.load %arg0[%c0, %c0_0] : memref<8x40xf32, #tpu.memory_space<vmem>>, vector<8x40xf32>
    %c0_1 = arith.constant 0 : index
    %c0_2 = arith.constant 0 : index
    %1 = vector.load %arg1[%c0_1, %c0_2] : memref<40x20xf32, #tpu.memory_space<vmem>>, vector<40x20xf32>
    %cst = arith.constant dense<0.000000e+00> : vector<8x20xf32>
    %2 = tpu.matmul %0, %1, %cst {dimension_numbers = #tpu.dot_dimension_numbers<[1], [0], [0], [1], [0, 0, 1, 1], [], []>} : vector<8x40xf32>, vector<40x20xf32>, vector<8x20xf32> -> vector<8x20xf32>
    %c0_3 = arith.constant 0 : index
    %c0_4 = arith.constant 0 : index
    %3 = vector.load %arg2[%c0_3, %c0_4] : memref<1x20xf32, #tpu.memory_space<vmem>>, vector<1x20xf32>
    %4 = vector.broadcast %3 : vector<1x20xf32> to vector<8x20xf32>
    %5 = arith.addf %2, %4 : vector<8x20xf32>
    %c0_5 = arith.constant 0 : index
    %c0_6 = arith.constant 0 : index
    %6 = vector.load %arg3[%c0_5, %c0_6] : memref<8x20xf32, #tpu.memory_space<vmem>>, vector<8x20xf32>
    tpu.vector_store %arg3[%c0_5, %c0_6], %5 {strides = array<i32>} : memref<8x20xf32, #tpu.memory_space<vmem>>, vector<8x20xf32>,
    return
  }
}

</mosaic_0001>

<bundles_post_ra>
// kernel: mynet_forward.1
= control target key start
LH: loop header
LB: loop body
LE: loop exit
PB: predicated region body
PF: predicated region fallthrough
CT: control target
= control target key end

     0   :  { %v173_v3 = vmov 0.0|0.0   ;;  %vm174_vm0 = vmmov 0   ;;  %v175_v6 = vmov 0.0   ;;  %s230_s0 = inlined_call_operand.vmem [shape: f32[8,40], index: 0, kind: input, shape index: {}]   ;;  %s231_s1 = inlined_call_operand.vmem [shape: f32[40,20], index: 1, kind: input, shape index: {}]   ;;  %s232_s2 = inlined_call_operand.vmem [shape: f32[1,20], index: 2, kind: input, shape index: {}]   ;;  %s233_s3 = inlined_call_operand.hbm [shape: f32[8,20], index: 3, kind: output, shape index: {}]  }
   0x1   :  { %v16_v0 = vld [vmem:[%s231_s1] sm:$0xff]  ;;  %v17_v1 = vld [vmem:[%s231_s1 + $0x8] sm:$0xff]  ;;  %v18_v2 = vld [vmem:[%s231_s1 + $0x10] sm:$0xff]  ;;  %139 = vmatprep.subr.bf16.mxu0 %v173_v3  ;;  %136 = vmatprep.mubr.msk.f32.mxu0 %vm174_vm0, %v175_v6 }
   0x2   :  { %v140_v4 = vpack.c.bf16 %v17_v1, %v16_v0  ;;  %v19_v5 = vld [vmem:[%s231_s1 + $0x18] sm:$0xff] }
   0x3   :  { %8 = vsyncpa [#allocation3], 0  ;;  %v143_v7 = vpack.c.bf16 %v19_v5, %v18_v2  ;;  %v20_v8 = vld [vmem:[%s231_s1 + $0x20] sm:$0xff]  ;;  %vm28_vm1 = vcmask 326656   ;;  %s176_s26 = smov [#allocation2]   ;;  %vm102_vm2 = vcmask 162816  }
   0x4   :  { %141 = vmatpush3.bf16.msra.mxu0 %v140_v4  ;;  %v15_v9 = vld [vmem:[%s230_s0] sm:$0xff]  ;;  %s110_s27 = sshll.u32 %s176_s26, 4  ;;  %s111_s27 = int_to_ptr.vmem [resolvable:$true] %s110_s27 }
   0x5   :  { %142 = vmatprep.subr.bf16.mxu0 %v173_v3  ;;  %v118_v10 = vld [vmem:[%s232_s2] ss:$0 sm:$0xff]  ;;  %s149_s1 = scalar_lea.vmem %s111_s27, 128  ;;  %p154_p1 = scmp.lt.s32.totalorder %s111_s27, %s111_s27 }
   0x6   :  { %p150_p0 = scmp.ne.s32.totalorder %s111_s27, %s149_s1  ;;  %p155_p2 = scmp.lt.s32.totalorder %s149_s1, %s149_s1 }
   0x8   :  { %144 = vmatpush3.bf16.msra.mxu0 %v143_v7  ;;  %p156_p3 = por %p155_p2, %p154_p1 }
   0x9   :  { %134 = vmatprep.subr.mxu0 %v175_v6 }
   0xa   :  { %p157_p4 = pnand %p156_p3, %p150_p0 }
   0xc   :  { %135 = vmatpush3.msra.mxu0 %v20_v8 }
   0xd   :  { %137 = vmatmul.mubr.msk.f32.vlgmr.msra.gmra.mrb[0].mxu0 %vm28_vm1, %v15_v9 }
  0xe0   :  { %v98_v11 = vpop.f32.mrb[0].mxu0 }
  0xe1   :  { %v99_v12 = vadd.f32 %v118_v10, %v98_v11  ;;  %v138_v13 = vpop.f32.mrb[1].mxu0 }
  0xe3   :  { %103 = vst.msk [vmem:[#allocation2] sm:$0xff] %vm102_vm2, %v99_v12 }
  0xe4   :  { %160 = shalt.err (!%p157_p4)
}
  0xe5   :  { %s161_s29 = scalar_lea.hbm %s233_s3, 128 }
  0xe6   :  { %p162_p5 = scmp.ne.s32.totalorder %s233_s3, %s161_s29  ;;  %p165_p6 = scmp.lt.u32.totalorder %s161_s29, %s233_s3 }
  0xe8   :  { %p167_p7 = pnand %p165_p6, %p162_p5 }
  0xea   :  { %170 = shalt.err (!%p167_p7)
}
  0xeb   :  { %113 = dma.vmem_to_hbm [thread:$0]  %s111_s27, 128, %s233_s3, [#allocation3]  }
  0xec   :  { %171 = dma.done.wait [#allocation3], 128  }
  0xed   :  { %172 = vsyncadd [#allocation3], 4294967168 }
  0xee   :  { %117 = vsyncpa [#allocation3], 1 }

</bundles_post_ra>
